<compile_context>
chip_gen: v6e
topology: v6e:2x2x1
jax: 0.10.0
libtpu: 0.0.40
codegen_flags: <defaults>
</compile_context>

<pallas_src>
import math
import functools

import jax
import jax.numpy as jnp
from jax.experimental import pallas as pl
from jax.experimental.pallas import tpu as pltpu


def _equal_conv2d_kernel(x_ref, w_ref, b_ref, o_ref, *, G, Ht, scale):
    """One (batch, row-tile, Cout-tile) block.

    x_ref: (Ht_in, Wo_pad, Kc)  packed input rows (Ht_in = Ht for G == 1,
                                                   Ht_in = Ht + K - 1 for G == K)
    w_ref: (G, Kc, OT)          packed, UNscaled weights for this Cout tile
    b_ref: (1, OT)              f32 bias for this Cout tile
    o_ref: (Ht, Wo_pad, OT)     lane-dense output tile
    """
    Wo_pad = o_ref.shape[1]
    OT = o_ref.shape[2]
    Kc = w_ref.shape[1]
    M = Ht * Wo_pad

    # Static tap loop; partials accumulated in a LOCAL f32 value (no per-tap
    # accumulator round-trips through VMEM).
    acc = None
    for g in range(G):
        lhs = x_ref[g:g + Ht, :, :].reshape(M, Kc)
        part = jnp.dot(lhs, w_ref[g], preferred_element_type=jnp.float32)
        acc = part if acc is None else acc + part

    # Single post-loop scale + bias (one VPU pass), then a dense 128-lane store.
    out = acc * jnp.float32(scale) + b_ref[...]
    o_ref[...] = out.reshape(Ht, Wo_pad, OT).astype(o_ref.dtype)


def _chip_params():
    """(Cout-tile width, per-block VMEM budget, vmem_limit cap) by generation."""
    kind = ""
    try:
        kind = jax.devices()[0].device_kind.lower()
    except Exception:
        pass
    if ("v5 lite" in kind) or ("v5e" in kind) or ("v5lite" in kind):
        # v5e: 128 MiB VMEM, 4x(128x128) MXU -> 128 is the native N tile.
        return 128, 48 << 20, 100 << 20
    if any(t in kind for t in ("v4", "v5", "v6")):
        # v4 / v5p / v6e: 128 MiB VMEM, 256-wide MXU on v6e.
        return 256, 48 << 20, 100 << 20
    # v7x (64 MiB VMEM per TensorCore) or unknown chip: be conservative.
    return 256, 20 << 20, 40 << 20


def _block_bytes(Ht, Ht_in, Wo_pad, Kc, G, OT, in_bytes, out_bytes):
    x_b = Ht_in * Wo_pad * Kc * in_bytes
    w_b = G * Kc * OT * in_bytes
    o_b = Ht * Wo_pad * OT * out_bytes
    acc_b = Ht * Wo_pad * OT * 4               # local f32 accumulator
    return 2 * (x_b + w_b + o_b) + acc_b       # in/out double-buffered


def _choose_row_tile(Ho, Wo_pad, Kc, G, K, OT, in_bytes, out_bytes, budget):
    halo = 0 if G == 1 else K - 1
    Ht = Ho
    while Ht > 1 and _block_bytes(Ht, Ht + halo, Wo_pad, Kc, G, OT,
                                  in_bytes, out_bytes) > budget:
        Ht = (Ht + 1) // 2
    # Balance tiles so Ho_pad wastes as few rows as possible.
    n_rt = -(-Ho // Ht)
    Ht = -(-Ho // n_rt)
    return Ht


def equal_conv2d(x, weight, bias=None, *, stride=1, padding=0, mxu_dtype=None):
    """EqualConv2d forward. x: (N, Cin, H, W); weight: (Cout, Cin, K, K).

    mxu_dtype: optional MXU operand dtype (e.g. jnp.bfloat16).  Accumulation
    stays f32 and the output keeps x.dtype.
    """
    N, C, H, W = x.shape
    O = weight.shape[0]
    K = weight.shape[2]
    scale = 1.0 / math.sqrt(C * K * K)

    Hp, Wp = H + 2 * padding, W + 2 * padding
    Ho = (Hp - K) // stride + 1
    Wo = (Wp - K) // stride + 1

    OT_max, blk_budget, vmem_cap = _chip_params()
    out_dtype = x.dtype
    comp_dtype = jnp.dtype(mxu_dtype) if mxu_dtype is not None else jnp.dtype(x.dtype)

    # ---- wrapper-side layout plumbing (XLA glue) ----
    xp = jnp.pad(x, ((0, 0), (0, 0), (padding, padding), (padding, padding)))
    x_nhwc = jnp.transpose(xp, (0, 2, 3, 1)).astype(comp_dtype)   # (N, Hp, Wp, C)
    w_t = jnp.transpose(weight, (2, 3, 1, 0)).astype(comp_dtype)  # (K, K, C, O)

    # Lane-dense output: pad Cout to a multiple of 128 and tile it.
    O_pad = -(-O // 128) * 128
    OT = OT_max if O_pad % OT_max == 0 else 128
    n_ot = O_pad // OT
    # Wo padded to a multiple of 8 so in-kernel row merges stay tile-aligned.
    Wo_pad = -(-Wo // 8) * 8

    if stride == 1 and K * C >= 128:
        G, Kc = K, K * C          # kw-only packing: HBM duplication limited to Kx
    else:
        G, Kc = 1, K * K * C      # full im2col: deep contraction for small Cin / strided

    Ht = _choose_row_tile(Ho, Wo_pad, Kc, G, K, OT,
                          comp_dtype.itemsize, jnp.dtype(out_dtype).itemsize,
                          blk_budget)
    n_rt = -(-Ho // Ht)
    Ho_pad = n_rt * Ht

    if G == 1:
        # Stride-exact im2col: (N, Ho, Wo, K*K*C), then pad spatial dims.
        x_pack = jnp.concatenate(
            [x_nhwc[:, kh:kh + (Ho - 1) * stride + 1:stride,
                    kw:kw + (Wo - 1) * stride + 1:stride, :]
             for kh in range(K) for kw in range(K)], axis=-1)
        x_pack = jnp.pad(
            x_pack, ((0, 0), (0, Ho_pad - Ho), (0, Wo_pad - Wo), (0, 0)))
        w_pk = w_t.reshape(1, K * K * C, O)
        x_block = (None, Ht, Wo_pad, Kc)
    else:
        # kw packed onto lanes: (N, Hp, Wo, K*C); kh halo carried as K-1 extra
        # rows per overlapping row-tile slab.
        x_kw = jnp.concatenate(
            [x_nhwc[:, :, kw:kw + Wo, :] for kw in range(K)], axis=-1)
        x_kw = jnp.pad(
            x_kw, ((0, 0), (0, Ho_pad - Ho), (0, Wo_pad - Wo), (0, 0)))
        x_pack = jnp.stack(
            [x_kw[:, r * Ht:r * Ht + Ht + K - 1] for r in range(n_rt)], axis=1)
        w_pk = w_t.reshape(K, K * C, O)
        x_block = (None, None, Ht + K - 1, Wo_pad, Kc)

    w_pk = jnp.pad(w_pk, ((0, 0), (0, 0), (0, O_pad - O)))
    b = bias if bias is not None else jnp.zeros((O,), jnp.float32)
    b_pk = jnp.pad(b.astype(jnp.float32), (0, O_pad - O)).reshape(1, O_pad)

    # Grid ordering heuristic: keep the larger of {weight tile, x row tile}
    # resident across consecutive grid steps.
    halo = 0 if G == 1 else K - 1
    x_tile_bytes = (Ht + halo) * Wo_pad * Kc * comp_dtype.itemsize
    w_tile_bytes = G * Kc * OT * comp_dtype.itemsize
    if w_tile_bytes >= x_tile_bytes:
        grid = (n_ot, N, n_rt)
        if G == 1:
            x_map = lambda j, n, r: (n, r, 0, 0)
        else:
            x_map = lambda j, n, r: (n, r, 0, 0, 0)
        w_map = lambda j, n, r: (0, 0, j)
        b_map = lambda j, n, r: (0, j)
        o_map = lambda j, n, r: (n, r, 0, j)
    else:
        grid = (N, n_rt, n_ot)
        if G == 1:
            x_map = lambda n, r, j: (n, r, 0, 0)
        else:
            x_map = lambda n, r, j: (n, r, 0, 0, 0)
        w_map = lambda n, r, j: (0, 0, j)
        b_map = lambda n, r, j: (0, j)
        o_map = lambda n, r, j: (n, r, 0, j)

    blk_bytes = _block_bytes(Ht, Ht + halo, Wo_pad, Kc, G, OT,
                             comp_dtype.itemsize, jnp.dtype(out_dtype).itemsize)
    vmem_limit = int(min(max(blk_bytes + (4 << 20), 16 << 20), vmem_cap))

    cost = pl.CostEstimate(
        flops=2 * N * Ho * Wo * K * K * C * O,
        transcendentals=0,
        bytes_accessed=int(x_pack.size * comp_dtype.itemsize
                           + w_pk.size * comp_dtype.itemsize
                           + b_pk.size * 4
                           + N * Ho_pad * Wo_pad * O_pad
                           * jnp.dtype(out_dtype).itemsize),
    )

    kernel = functools.partial(_equal_conv2d_kernel, G=G, Ht=Ht, scale=scale)

    out = pl.pallas_call(
        kernel,
        out_shape=jax.ShapeDtypeStruct((N, Ho_pad, Wo_pad, O_pad), out_dtype),
        grid=grid,
        in_specs=[
            pl.BlockSpec(x_block, x_map),
            pl.BlockSpec((G, Kc, OT), w_map),
            pl.BlockSpec((1, OT), b_map),
        ],
        out_specs=pl.BlockSpec((None, Ht, Wo_pad, OT), o_map),
        compiler_params=pltpu.CompilerParams(
            dimension_semantics=("parallel", "parallel", "parallel"),
            vmem_limit_bytes=vmem_limit),
        cost_estimate=cost,
    )(x_pack, w_pk, b_pk)

    out = out[:, :Ho, :Wo, :O]                      # drop spatial / Cout padding
    return jnp.transpose(out, (0, 3, 1, 2))         # back to NCHW


if __name__ == "__main__":
    key = jax.random.PRNGKey(0)

    def reference(x, weight, bias, stride, padding):
        scale = 1.0 / math.sqrt(weight.shape[1] * weight.shape[2] ** 2)
        out = jax.lax.conv_general_dilated(
            x, weight * scale, (stride, stride),
            [(padding, padding), (padding, padding)],
            dimension_numbers=("NCHW", "OIHW", "NCHW"),
            precision=jax.lax.Precision.HIGHEST)
        return out + bias.reshape(1, -1, 1, 1)

    cases = [
        # name,          N, C,  H,  W,  O,   K, stride, pad, mxu_dtype,     tol
        ("g1_stride1",   2, 4,  16, 16, 8,   3, 1,      1,   None,          2e-4),
        ("g1_stride2",   2, 4,  16, 16, 8,   3, 2,      1,   None,          2e-4),
        ("gk_stride1",   1, 48, 16, 16, 128, 3, 1,      1,   None,          1e-3),
        ("g1_bf16_mxu",  2, 4,  16, 16, 8,   3, 1,      1,   jnp.bfloat16,  5e-2),
    ]

    for i, (name, N, C, H, W, O, K, stride, padding, mxu_dtype, tol) in enumerate(cases):
        kx, kw, kb = jax.random.split(jax.random.fold_in(key, i), 3)
        x = jax.random.normal(kx, (N, C, H, W), dtype=jnp.float32)
        weight = jax.random.normal(kw, (O, C, K, K), dtype=jnp.float32)
        bias = 0.1 * jax.random.normal(kb, (O,), dtype=jnp.float32)

        out = equal_conv2d(x, weight, bias, stride=stride, padding=padding,
                           mxu_dtype=mxu_dtype)
        out = jax.block_until_ready(out)
        ref = reference(x, weight, bias, stride, padding)
        assert out.shape == ref.shape, (name, out.shape, ref.shape)
        err = float(jnp.max(jnp.abs(out - ref)))
        assert jnp.allclose(out, ref, atol=tol, rtol=tol), (name, err)

    print("KERNEL_OK")
</pallas_src>

<mosaic_0001>
module attributes {stable_mosaic.version = 11 : i64} {
  func.func @_equal_conv2d_kernel(%arg0: i32, %arg1: i32, %arg2: i32, %arg3: memref<1x16x16x36xf32, #tpu.memory_space<vmem>>, %arg4: memref<1x36x128xf32, #tpu.memory_space<vmem>>, %arg5: memref<1x128xf32, #tpu.memory_space<vmem>>, %arg6: memref<1x16x16x128xf32, #tpu.memory_space<vmem>>) attributes {dimension_semantics = [#tpu.dimension_semantics<parallel>, #tpu.dimension_semantics<parallel>, #tpu.dimension_semantics<parallel>], iteration_bounds = array<i64: 2, 1, 1>, scalar_prefetch = 0 : i64, scratch_operands = 0 : i64, tpu.core_type = #tpu.core_type<tc>, window_params = [{transform_indices = @transform_0, window_bounds = array<i64: 1, 16, 16, 36>}, {transform_indices = @transform_1, window_bounds = array<i64: 1, 36, 128>}, {transform_indices = @transform_2, window_bounds = array<i64: 1, 128>}, {transform_indices = @transform_3, window_bounds = array<i64: 1, 16, 16, 128>}]} {
    %c0 = arith.constant 0 : index
    %c0_0 = arith.constant 0 : index
    %c0_1 = arith.constant 0 : index
    %c0_2 = arith.constant 0 : index
    %0 = vector.load %arg3[%c0, %c0_0, %c0_1, %c0_2] : memref<1x16x16x36xf32, #tpu.memory_space<vmem>>, vector<1x16x16x36xf32>
    %1 = vector.shape_cast %0 : vector<1x16x16x36xf32> to vector<16x16x36xf32>
    %2 = vector.shape_cast %1 : vector<16x16x36xf32> to vector<256x36xf32>
    %c0_3 = arith.constant 0 : index
    %c0_4 = arith.constant 0 : index
    %c0_5 = arith.constant 0 : index
    %3 = vector.load %arg4[%c0_3, %c0_4, %c0_5] : memref<1x36x128xf32, #tpu.memory_space<vmem>>, vector<1x36x128xf32>
    %4 = vector.shape_cast %3 : vector<1x36x128xf32> to vector<36x128xf32>
    %cst = arith.constant dense<0.000000e+00> : vector<256x128xf32>
    %5 = tpu.matmul %2, %4, %cst {dimension_numbers = #tpu.dot_dimension_numbers<[1], [0], [0], [1], [0, 0, 1, 1], [], []>} : vector<256x36xf32>, vector<36x128xf32>, vector<256x128xf32> -> vector<256x128xf32>
    %cst_6 = arith.constant 0.166666672 : f32
    %6 = vector.broadcast %cst_6 : f32 to vector<256x128xf32>
    %7 = arith.mulf %5, %6 : vector<256x128xf32>
    %c0_7 = arith.constant 0 : index
    %c0_8 = arith.constant 0 : index
    %8 = vector.load %arg5[%c0_7, %c0_8] : memref<1x128xf32, #tpu.memory_space<vmem>>, vector<1x128xf32>
    %9 = vector.broadcast %8 : vector<1x128xf32> to vector<256x128xf32>
    %10 = arith.addf %7, %9 : vector<256x128xf32>
    %11 = vector.shape_cast %10 : vector<256x128xf32> to vector<16x16x128xf32>
    %c0_9 = arith.constant 0 : index
    %c0_10 = arith.constant 0 : index
    %c0_11 = arith.constant 0 : index
    %c0_12 = arith.constant 0 : index
    %12 = vector.load %arg6[%c0_9, %c0_10, %c0_11, %c0_12] : memref<1x16x16x128xf32, #tpu.memory_space<vmem>>, vector<1x16x16x128xf32>
    %13 = vector.shape_cast %12 : vector<1x16x16x128xf32> to vector<16x16x128xf32>
    %14 = vector.shape_cast %11 : vector<16x16x128xf32> to vector<1x16x16x128xf32>
    tpu.vector_store %arg6[%c0_9, %c0_10, %c0_11, %c0_12], %14 {strides = array<i32>} : memref<1x16x16x128xf32, #tpu.memory_space<vmem>>, vector<1x16x16x128xf32>,
    return
  }
  func.func @transform_0(%arg0: i32, %arg1: i32, %arg2: i32) -> (i32, i32, i32, i32) {
    %c0_i32 = arith.constant 0 : i32
    %c0_i32_0 = arith.constant 0 : i32
    %c0_i32_1 = arith.constant 0 : i32
    return %arg0, %arg1, %c0_i32, %c0_i32_0 : i32, i32, i32, i32
  }
  func.func @transform_1(%arg0: i32, %arg1: i32, %arg2: i32) -> (i32, i32, i32) {
    %c0_i32 = arith.constant 0 : i32
    %c0_i32_0 = arith.constant 0 : i32
    %c0_i32_1 = arith.constant 0 : i32
    return %c0_i32, %c0_i32_0, %arg2 : i32, i32, i32
  }
  func.func @transform_2(%arg0: i32, %arg1: i32, %arg2: i32) -> (i32, i32) {
    %c0_i32 = arith.constant 0 : i32
    %c0_i32_0 = arith.constant 0 : i32
    return %c0_i32, %arg2 : i32, i32
  }
  func.func @transform_3(%arg0: i32, %arg1: i32, %arg2: i32) -> (i32, i32, i32, i32) {
    %c0_i32 = arith.constant 0 : i32
    %c0_i32_0 = arith.constant 0 : i32
    return %arg0, %arg1, %c0_i32, %arg2 : i32, i32, i32, i32
  }
}

</mosaic_0001>

<bundles_post_ra>
// kernel: tpu_custom_call.1
= control target key start
LH: loop header
LB: loop body
LE: loop exit
PB: predicated region body
PF: predicated region fallthrough
CT: control target
= control target key end

     0   :  { %8 = vsyncpa [#allocation3], 0  ;;  %s1515_s0 = inlined_call_operand.hbm [shape: f32[2,16,16,36], index: 0, kind: input, shape index: {}]   ;;  %s1516_s1 = inlined_call_operand.vmem [shape: f32[1,36,128], index: 1, kind: input, shape index: {}]   ;;  %s1517_s2 = inlined_call_operand.vmem [shape: f32[1,128], index: 2, kind: input, shape index: {}]   ;;  %s1518_s3 = inlined_call_operand.hbm [shape: f32[2,16,16,128], index: 3, kind: output, shape index: {}]  }
   0x1   :  { %10 = vsyncpa [#allocation3 + $0x1], 0 }
   0x2   :  { %11 = vsyncpa [#allocation4], 0 }
   0x3   :  { %13 = vsyncpa [#allocation4 + $0x1], 0  ;;  %s1212_s12 = smov 0   ;;  %s1214_s13 = smov 0  }
   0x4   :  { %s1216_s14 = smov 0   ;;  %s1218_s15 = smov 0  }
   0x5   :  { %s1220_s16 = smov 0   ;;  %s1222_s17 = smov 0  }
   0x6 LB: > { %s852_s18 = sadd.s32 4294967295, %s1184_s17   ;;  %s853_s19 = sadd.s32 4294967294, %s1184_s17   ;;  %s1184_s17 = sphi %s1222_s17, %s19_s17   ;;  %s1180_s16 = sphi %s1220_s16, %s1529_s16   ;;  %s1176_s15 = sphi %s1218_s15, %s1528_s15   ;;  %s1172_s14 = sphi %s1216_s14, %s1527_s14   ;;  %s1168_s13 = sphi %s1214_s13, %s1526_s13   ;;  %s1164_s12 = sphi %s1212_s12, %s1525_s12  }
   0x7   : > { %s38_s20 = sadd.s32 1, %s1180_s16  ;;  %s47_s21 = sadd.s32 1, %s1172_s14 }
   0x8   : > { %p40_p0 = scmp.ge.s32.totalorder %s38_s20, 2  ;;  %p54_p1 = scmp.ne.s32.totalorder %s1172_s14, %s1168_s13 }
   0x9   : > { %p55_p2 = scmp.eq.s32.totalorder %s1184_s17, 0  ;;  %p60_p3 = scmp.ne.s32.totalorder %s1168_s13, %s1164_s12 }
   0xa   : > { %s1531_s20 = smov (%p40_p0, %s38_s20), 0  ;;  %p61_p5 = scmp.eq.s32.totalorder %s852_s18, 0 }
   0xb   : > { %p1253_p4 = por %p55_p2, %p54_p1  ;;  %s42_s23 = ssub.s32 %s1180_s16, %s1531_s20 }
   0xc   : > { %p140_p6 = scmp.eq.s32.totalorder %s852_s18, 1  ;;  %p45_p7 = scmp.eq.s32.totalorder %s42_s23, 0 }
   0xd   : > { %p1259_p8 = por %p61_p5, %p60_p3  ;;  %p146_p10 = scmp.eq.s32.totalorder %s853_s19, 1 }
   0xe   : > { %p1263_p9 = por %p140_p6, %p54_p1  ;;  %p1022_p13 = scmp.lt.s32.totalorder %s1184_s17, 2 }
   0xf   : > { %s1268_s26 = scalar_select %p45_p7, %s1172_s14, %s47_s21  }
  0x10   : > { %p1270_p11 = por %p146_p10, %p60_p3  ;;  %s179_s28 = sand.u32 1, %s1172_s14  }
  0x11   : > { %s858_s29 = sshll.u32 %s179_s28, 8  ;;  %s903_s30 = sshll.u32 %s1180_s16, 12 }
  0x12   : > { %s192_s6 = scalar_lea.hbm %s1515_s0, %s903_s30  ;;  %s183_s7 = scalar_lea.vmem [#allocation2], %s858_s29 }
  0x13   : > { %s193_s8 = sshll.u32 %s183_s7, 4  ;;  %p1283_p0 = pnand %p1022_p13, %p1253_p4  ;;  %s194_s8 = int_to_ptr.vmem [resolvable:$true] %s193_s8 }
  0x14   : > { %p861_p1 = scmp.ge.s32.totalorder %s1184_s17, 1  ;;  %s180_s10 = scalar_lea.sflag [#allocation3], %s179_s28 }
  0x15   : > { %p1078_p2 = pneg %p1283_p0  ;;  %s1089_s11 = scalar_lea.vmem %s194_s8, 4096 }
  0x16   : > { %p1090_p3 = scmp.ne.s32.totalorder %s194_s8, %s1089_s11  ;;  %s1186_s18 = smov [#allocation2]  }
  0x17   : > { %s1094_s19 = sshll.u32 %s1186_s18, 4  ;;  %s1095_s19 = int_to_ptr.vmem [resolvable:$false] %s1094_s19 }
  0x18   : > { %p1092_p5 = pnand %p1090_p3, %p1078_p2  ;;  %s1096_s21 = scalar_lea.vmem %s1095_s19, 8192 }
  0x19   : > { %p1097_p7 = scmp.lt.s32.totalorder %s194_s8, %s1095_s19  ;;  %p1098_p10 = scmp.lt.s32.totalorder %s1096_s21, %s1089_s11 }
  0x1a   : > { %p1093_p6 = pneg %p1092_p5 }
  0x1b   : > { %p1099_p12 = por %p1098_p10, %p1097_p7 }
  0x1d   : > { %p1100_p4 = pnand %p1099_p12, %p1093_p6 }
  0x1f   : > { %1103 = shalt.err (!%p1100_p4)
}
  0x20   : > { %s1187_s22 = smov 128   ;;  %s1188_s23 = smov 8  }
  0x21   : > { %1017 = dma.hbm_to_vmem [thread:$0]  (!%p1283_p0), %s192_s6, 4096, %s194_s8, %s180_s10, %s1187_s22, %s1187_s22, %s1188_s23  }
  0x22   : > { %p201_p13 = scmp.lt.s32.totalorder %s1184_s17, 3 }
  0x24   : > { %p202_p2 = pnand %p861_p1, %p201_p13 }
  0x25   : > { %s1296_s28 = sand.u32 (!%p202_p2), 1, %s1168_s13  }
  0x26   : > { %205 = sbr.rel (%p202_p2) target bundleno = 297 (0x129), region = 32  ;;  %s862_s29 = sshll.u32 (!%p202_p2), %s1296_s28, 8 }
  0x27   : > { %s208_s30 = scalar_lea.sflag (!%p202_p2), [#allocation3], %s1296_s28  ;;  %s1302_s4 = scalar_lea.vmem (!%p202_p2), [#allocation2], %s862_s29 }
  0x2b   : > { %1155 = dma.done.wait (%p1259_p8), %s208_s30, 4096  }
  0x2c   : > { %1157 = vsyncadd (%p1259_p8), %s208_s30, 4294963200  ;;  %vm384_vm0 = vcmask 1043456   ;;  %v286_v0 = vld [vmem:[%s1516_s1 + $0x20] sm:$0xf]  ;;  %v285_v1 = vld [vmem:[%s1516_s1 + $0x18] sm:$0xff]  ;;  %vm287_vm1 = vcmask 293888  }
  0x2d   : > { %942 = vmatprep.subr.msk.mxu0 %vm384_vm0, %v286_v0  ;;  %1000 = vmatprep.subr.msk.mxu1 %vm384_vm0, %v286_v0  ;;  %v284_v2 = vld [vmem:[%s1516_s1 + $0x10] sm:$0xff]  ;;  %v283_v3 = vld [vmem:[%s1516_s1 + $0x8] sm:$0xff]  ;;  %v282_v4 = vld [vmem:[%s1516_s1] sm:$0xff]  ;;  %s1396_s23 = scalar_lea.vmem [#allocation5], %s862_s29  ;;  %s904_s29 = sshll.u32 %s1176_s15, 12 }
  0x2e   : > { %943 = vmatpush3.msk.msra.mxu0 %vm384_vm0, %v286_v0  ;;  %1005 = vmatpush3.msk.msra.mxu1 %vm384_vm0, %v286_v0  ;;  %v250_v5 = vld [vmem:[%s1302_s4] sm:$0xff]  ;;  %v251_v7 = vld [vmem:[%s1302_s4 + $0x8] sm:$0xff]  ;;  %v252_v9 = vld [vmem:[%s1302_s4 + $0x10] sm:$0xff]  ;;  %s734_s30 = sshll.u32 %s1396_s23, 4  ;;  %s1459_s6 = scalar_lea.hbm %s1518_s3, %s904_s29  ;;  %s1461_s30 = int_to_ptr.vmem [resolvable:$true] %s734_s30 }
  0x2f   : > { %944 = vmatprep.subr.mxu0 %v285_v1  ;;  %1001 = vmatprep.subr.mxu1 %v285_v1  ;;  %v266_v6 = vld [vmem:[%s1302_s4 + $0x80] sm:$0xff]  ;;  %v267_v8 = vld [vmem:[%s1302_s4 + $0x88] sm:$0xff]  ;;  %v268_v10 = vld [vmem:[%s1302_s4 + $0x90] sm:$0xff]  ;;  %s717_s15 = scalar_lea.sflag [#allocation4], %s1296_s28  ;;  %s1104_s7 = scalar_lea.vmem %s1461_s30, 4096 }
  0x30   : > { %945 = vmatpush3.msra.mxu0 %v285_v1  ;;  %1006 = vmatpush3.msra.mxu1 %v285_v1  ;;  %v253_v11 = vld [vmem:[%s1302_s4 + $0x18] sm:$0xff]  ;;  %v254_v13 = vld [vmem:[%s1302_s4 + $0x20] sm:$0xff]  ;;  %v255_v15 = vld [vmem:[%s1302_s4 + $0x28] sm:$0xff]  ;;  %p1105_p8 = scmp.ne.s32.totalorder %s1461_s30, %s1104_s7  ;;  %s1189_s8 = smov [#allocation5]  }
  0x31   : > { %946 = vmatprep.subr.mxu0 %v284_v2  ;;  %1002 = vmatprep.subr.mxu1 %v284_v2  ;;  %v269_v12 = vld [vmem:[%s1302_s4 + $0x98] sm:$0xff]  ;;  %v270_v14 = vld [vmem:[%s1302_s4 + $0xa0] sm:$0xff]  ;;  %v271_v16 = vld [vmem:[%s1302_s4 + $0xa8] sm:$0xff]  ;;  %s1108_s9 = sshll.u32 %s1189_s8, 4  ;;  %s1109_s9 = int_to_ptr.vmem [resolvable:$false] %s1108_s9 }
  0x32   : > { %947 = vmatpush3.msra.mxu0 %v284_v2  ;;  %1007 = vmatpush3.msra.mxu1 %v284_v2  ;;  %v256_v17 = vld [vmem:[%s1302_s4 + $0x30] sm:$0xff]  ;;  %v257_v19 = vld [vmem:[%s1302_s4 + $0x38] sm:$0xff]  ;;  %v258_v21 = vld [vmem:[%s1302_s4 + $0x40] sm:$0xff]  ;;  %p1106_p12 = pnand %p1105_p8, %p1263_p9  ;;  %s1110_s10 = scalar_lea.vmem %s1109_s9, 8192 }
  0x33   : > { %948 = vmatprep.subr.mxu0 %v283_v3  ;;  %1003 = vmatprep.subr.mxu1 %v283_v3  ;;  %v272_v18 = vld [vmem:[%s1302_s4 + $0xb0] sm:$0xff]  ;;  %v273_v20 = vld [vmem:[%s1302_s4 + $0xb8] sm:$0xff]  ;;  %v274_v22 = vld [vmem:[%s1302_s4 + $0xc0] sm:$0xff]  ;;  %p1111_p1 = scmp.lt.s32.totalorder %s1461_s30, %s1109_s9  ;;  %p1112_p3 = scmp.lt.s32.totalorder %s1110_s10, %s1104_s7 }
  0x34   : > { %949 = vmatpush3.msra.mxu0 %v283_v3  ;;  %1008 = vmatpush3.msra.mxu1 %v283_v3  ;;  %v259_v23 = vld [vmem:[%s1302_s4 + $0x48] sm:$0xff]  ;;  %v260_v25 = vld [vmem:[%s1302_s4 + $0x50] sm:$0xff]  ;;  %v261_v27 = vld [vmem:[%s1302_s4 + $0x58] sm:$0xff]  ;;  %p1107_p0 = pneg %p1106_p12 }
  0x35   : > { %950 = vmatprep.subr.mxu0 %v282_v4  ;;  %1004 = vmatprep.subr.mxu1 %v282_v4  ;;  %v275_v24 = vld [vmem:[%s1302_s4 + $0xc8] sm:$0xff]  ;;  %v276_v26 = vld [vmem:[%s1302_s4 + $0xd0] sm:$0xff]  ;;  %v277_v28 = vld [vmem:[%s1302_s4 + $0xd8] sm:$0xff]  ;;  %p1113_p5 = por %p1112_p3, %p1111_p1 }
  0x36   : > { %951 = vmatpush3.msra.mxu0 %v282_v4  ;;  %1009 = vmatpush3.msra.mxu1 %v282_v4  ;;  %v262_v29 = vld [vmem:[%s1302_s4 + $0x60] sm:$0xff]  ;;  %v263_v31 = vld [vmem:[%s1302_s4 + $0x68] sm:$0xff]  ;;  %v264_v33 = vld [vmem:[%s1302_s4 + $0x70] sm:$0xff] }
  0x37   : > { %952 = vmatprep.mubr.msk.f32.mxu0 %vm287_vm1, %v250_v5  ;;  %976 = vmatprep.mubr.msk.f32.mxu1 %vm287_vm1, %v266_v6  ;;  %v278_v30 = vld [vmem:[%s1302_s4 + $0xe0] sm:$0xff]  ;;  %v279_v32 = vld [vmem:[%s1302_s4 + $0xe8] sm:$0xff]  ;;  %v280_v34 = vld [vmem:[%s1302_s4 + $0xf0] sm:$0xff]  ;;  %p1114_p6 = pnand %p1113_p5, %p1107_p0 }
  0x38   : > { %953 = vmatmul.mubr.msk.f32.vlgmr.msra.gmra.mxu0 %vm287_vm1, %v251_v7  ;;  %977 = vmatmul.mubr.msk.f32.vlgmr.msra.gmra.mxu1 %vm287_vm1, %v267_v8  ;;  %v265_v35 = vld [vmem:[%s1302_s4 + $0x78] sm:$0xff]  ;;  %v1390_v38 = vld [vmem:[%s1517_s2] ss:$0 sm:$0xff] }
  0x39   : > { %955 = vmatprep.mubr.msk.f32.mxu0 %vm287_vm1, %v252_v9  ;;  %979 = vmatprep.mubr.msk.f32.mxu1 %vm287_vm1, %v268_v10  ;;  %v281_v36 = vld [vmem:[%s1302_s4 + $0xf8] sm:$0xff] }
  0x3c   : > { %956 = vmatmul.mubr.msk.f32.gmra.mxu0 %vm287_vm1, %v253_v11  ;;  %980 = vmatmul.mubr.msk.f32.gmra.mxu1 %vm287_vm1, %v269_v12 }
  0x3d   : > { %958 = vmatprep.mubr.msk.f32.mxu0 %vm287_vm1, %v254_v13  ;;  %982 = vmatprep.mubr.msk.f32.mxu1 %vm287_vm1, %v270_v14 }
  0x40   : > { %959 = vmatmul.mubr.msk.f32.gmra.mxu0 %vm287_vm1, %v255_v15  ;;  %983 = vmatmul.mubr.msk.f32.gmra.mxu1 %vm287_vm1, %v271_v16 }
  0x41   : > { %961 = vmatprep.mubr.msk.f32.mxu0 %vm287_vm1, %v256_v17  ;;  %985 = vmatprep.mubr.msk.f32.mxu1 %vm287_vm1, %v272_v18 }
  0x44   : > { %962 = vmatmul.mubr.msk.f32.gmra.mxu0 %vm287_vm1, %v257_v19  ;;  %986 = vmatmul.mubr.msk.f32.gmra.mxu1 %vm287_vm1, %v273_v20 }
  0x45   : > { %964 = vmatprep.mubr.msk.f32.mxu0 %vm287_vm1, %v258_v21  ;;  %988 = vmatprep.mubr.msk.f32.mxu1 %vm287_vm1, %v274_v22 }
  0x48   : > { %965 = vmatmul.mubr.msk.f32.gmra.mxu0 %vm287_vm1, %v259_v23  ;;  %989 = vmatmul.mubr.msk.f32.gmra.mxu1 %vm287_vm1, %v275_v24 }
  0x49   : > { %967 = vmatprep.mubr.msk.f32.mxu0 %vm287_vm1, %v260_v25  ;;  %991 = vmatprep.mubr.msk.f32.mxu1 %vm287_vm1, %v276_v26 }
  0x4c   : > { %968 = vmatmul.mubr.msk.f32.gmra.mxu0 %vm287_vm1, %v261_v27  ;;  %992 = vmatmul.mubr.msk.f32.gmra.mxu1 %vm287_vm1, %v277_v28 }
  0x4d   : > { %970 = vmatprep.mubr.msk.f32.mxu0 %vm287_vm1, %v262_v29  ;;  %994 = vmatprep.mubr.msk.f32.mxu1 %vm287_vm1, %v278_v30 }
  0x50   : > { %971 = vmatmul.mubr.msk.f32.gmra.mxu0 %vm287_vm1, %v263_v31  ;;  %995 = vmatmul.mubr.msk.f32.gmra.mxu1 %vm287_vm1, %v279_v32 }
  0x51   : > { %973 = vmatprep.mubr.msk.f32.mxu0 %vm287_vm1, %v264_v33  ;;  %997 = vmatprep.mubr.msk.f32.mxu1 %vm287_vm1, %v280_v34 }
  0x54   : > { %974 = vmatmul.mubr.msk.f32.gmra.mxu0 %vm287_vm1, %v265_v35  ;;  %998 = vmatmul.mubr.msk.f32.gmra.mxu1 %vm287_vm1, %v281_v36 }
  0xf8   : > { %v954_v37 = vpop.f32.mrf.mxu0  ;;  %v978_v39 = vpop.f32.mrf.mxu1 }
  0xf9   : > { %v614_v40 = vmul.f32 0.16666667, %v954_v37  ;;  %v630_v41 = vmul.f32 0.16666667, %v978_v39 }
  0xfa   : > { %v454_v42 = vpop.f32.mrf.mxu0  ;;  %v534_v43 = vpop.f32.mrf.mxu1 }
  0xfb   : > { %v653_v44 = vadd.f32 %v1390_v38, %v614_v40  ;;  %v669_v45 = vadd.f32 %v1390_v38, %v630_v41  ;;  %v613_v46 = vmul.f32 0.16666667, %v454_v42  ;;  %v629_v47 = vmul.f32 0.16666667, %v534_v43 }
  0xfc   : > { %v957_v48 = vpop.f32.mrf.mxu0  ;;  %v981_v49 = vpop.f32.mrf.mxu1 }
  0xfd   : > { %685 = vst [vmem:[%s1396_s23 + $0x8] sm:$0xff] %v653_v44  ;;  %701 = vst [vmem:[%s1396_s23 + $0x88] sm:$0xff] %v669_v45  ;;  %v652_v50 = vadd.f32 %v1390_v38, %v613_v46  ;;  %v668_v51 = vadd.f32 %v1390_v38, %v629_v47  ;;  %v616_v52 = vmul.f32 0.16666667, %v957_v48  ;;  %v632_v53 = vmul.f32 0.16666667, %v981_v49 }
  0xfe   : > { %v464_v54 = vpop.f32.mrf.mxu0  ;;  %v544_v55 = vpop.f32.mrf.mxu1 }
  0xff   : > { %684 = vst [vmem:[%s1396_s23] sm:$0xff] %v652_v50  ;;  %700 = vst [vmem:[%s1396_s23 + $0x80] sm:$0xff] %v668_v51  ;;  %v655_v56 = vadd.f32 %v1390_v38, %v616_v52  ;;  %v671_v57 = vadd.f32 %v1390_v38, %v632_v53  ;;  %v615_v58 = vmul.f32 0.16666667, %v464_v54  ;;  %v631_v59 = vmul.f32 0.16666667, %v544_v55 }
 0x100   : > { %v960_v60 = vpop.f32.mrf.mxu0  ;;  %v984_v61 = vpop.f32.mrf.mxu1 }
 0x101   : > { %687 = vst [vmem:[%s1396_s23 + $0x18] sm:$0xff] %v655_v56  ;;  %703 = vst [vmem:[%s1396_s23 + $0x98] sm:$0xff] %v671_v57  ;;  %v654_v62 = vadd.f32 %v1390_v38, %v615_v58  ;;  %v670_v63 = vadd.f32 %v1390_v38, %v631_v59  ;;  %v618_v0 = vmul.f32 0.16666667, %v960_v60  ;;  %v634_v1 = vmul.f32 0.16666667, %v984_v61 }
 0x102   : > { %v474_v2 = vpop.f32.mrf.mxu0  ;;  %v554_v3 = vpop.f32.mrf.mxu1 }
 0x103   : > { %686 = vst [vmem:[%s1396_s23 + $0x10] sm:$0xff] %v654_v62  ;;  %702 = vst [vmem:[%s1396_s23 + $0x90] sm:$0xff] %v670_v63  ;;  %v657_v4 = vadd.f32 %v1390_v38, %v618_v0  ;;  %v673_v5 = vadd.f32 %v1390_v38, %v634_v1  ;;  %v617_v6 = vmul.f32 0.16666667, %v474_v2  ;;  %v633_v7 = vmul.f32 0.16666667, %v554_v3 }
 0x104   : > { %v963_v8 = vpop.f32.mrf.mxu0  ;;  %v987_v9 = vpop.f32.mrf.mxu1 }
 0x105   : > { %689 = vst [vmem:[%s1396_s23 + $0x28] sm:$0xff] %v657_v4  ;;  %705 = vst [vmem:[%s1396_s23 + $0xa8] sm:$0xff] %v673_v5  ;;  %v656_v10 = vadd.f32 %v1390_v38, %v617_v6  ;;  %v672_v11 = vadd.f32 %v1390_v38, %v633_v7  ;;  %v620_v12 = vmul.f32 0.16666667, %v963_v8  ;;  %v636_v13 = vmul.f32 0.16666667, %v987_v9 }
 0x106   : > { %v484_v14 = vpop.f32.mrf.mxu0  ;;  %v564_v15 = vpop.f32.mrf.mxu1 }
 0x107   : > { %688 = vst [vmem:[%s1396_s23 + $0x20] sm:$0xff] %v656_v10  ;;  %704 = vst [vmem:[%s1396_s23 + $0xa0] sm:$0xff] %v672_v11  ;;  %v659_v16 = vadd.f32 %v1390_v38, %v620_v12  ;;  %v675_v17 = vadd.f32 %v1390_v38, %v636_v13  ;;  %v619_v18 = vmul.f32 0.16666667, %v484_v14  ;;  %v635_v19 = vmul.f32 0.16666667, %v564_v15 }
 0x108   : > { %v966_v20 = vpop.f32.mrf.mxu0  ;;  %v990_v21 = vpop.f32.mrf.mxu1 }
 0x109   : > { %691 = vst [vmem:[%s1396_s23 + $0x38] sm:$0xff] %v659_v16  ;;  %707 = vst [vmem:[%s1396_s23 + $0xb8] sm:$0xff] %v675_v17  ;;  %v658_v22 = vadd.f32 %v1390_v38, %v619_v18  ;;  %v674_v23 = vadd.f32 %v1390_v38, %v635_v19  ;;  %v622_v24 = vmul.f32 0.16666667, %v966_v20  ;;  %v638_v25 = vmul.f32 0.16666667, %v990_v21 }
 0x10a   : > { %v494_v26 = vpop.f32.mrf.mxu0  ;;  %v574_v27 = vpop.f32.mrf.mxu1 }
 0x10b   : > { %690 = vst [vmem:[%s1396_s23 + $0x30] sm:$0xff] %v658_v22  ;;  %706 = vst [vmem:[%s1396_s23 + $0xb0] sm:$0xff] %v674_v23  ;;  %v661_v28 = vadd.f32 %v1390_v38, %v622_v24  ;;  %v677_v29 = vadd.f32 %v1390_v38, %v638_v25  ;;  %v621_v30 = vmul.f32 0.16666667, %v494_v26  ;;  %v637_v31 = vmul.f32 0.16666667, %v574_v27 }
 0x10c   : > { %v969_v32 = vpop.f32.mrf.mxu0  ;;  %v993_v33 = vpop.f32.mrf.mxu1 }
 0x10d   : > { %693 = vst [vmem:[%s1396_s23 + $0x48] sm:$0xff] %v661_v28  ;;  %709 = vst [vmem:[%s1396_s23 + $0xc8] sm:$0xff] %v677_v29  ;;  %v660_v34 = vadd.f32 %v1390_v38, %v621_v30  ;;  %v676_v35 = vadd.f32 %v1390_v38, %v637_v31  ;;  %v624_v36 = vmul.f32 0.16666667, %v969_v32  ;;  %v640_v37 = vmul.f32 0.16666667, %v993_v33 }
 0x10e   : > { %v504_v39 = vpop.f32.mrf.mxu0  ;;  %v584_v40 = vpop.f32.mrf.mxu1 }
 0x10f   : > { %692 = vst [vmem:[%s1396_s23 + $0x40] sm:$0xff] %v660_v34  ;;  %708 = vst [vmem:[%s1396_s23 + $0xc0] sm:$0xff] %v676_v35  ;;  %v663_v41 = vadd.f32 %v1390_v38, %v624_v36  ;;  %v679_v42 = vadd.f32 %v1390_v38, %v640_v37  ;;  %v623_v43 = vmul.f32 0.16666667, %v504_v39  ;;  %v639_v44 = vmul.f32 0.16666667, %v584_v40 }
 0x110   : > { %v972_v45 = vpop.f32.mrf.mxu0  ;;  %v996_v46 = vpop.f32.mrf.mxu1 }
 0x111   : > { %695 = vst [vmem:[%s1396_s23 + $0x58] sm:$0xff] %v663_v41  ;;  %711 = vst [vmem:[%s1396_s23 + $0xd8] sm:$0xff] %v679_v42  ;;  %v662_v47 = vadd.f32 %v1390_v38, %v623_v43  ;;  %v678_v48 = vadd.f32 %v1390_v38, %v639_v44  ;;  %v626_v49 = vmul.f32 0.16666667, %v972_v45  ;;  %v642_v50 = vmul.f32 0.16666667, %v996_v46 }
 0x112   : > { %v514_v51 = vpop.f32.mrf.mxu0  ;;  %v594_v52 = vpop.f32.mrf.mxu1 }
 0x113   : > { %694 = vst [vmem:[%s1396_s23 + $0x50] sm:$0xff] %v662_v47  ;;  %710 = vst [vmem:[%s1396_s23 + $0xd0] sm:$0xff] %v678_v48  ;;  %v665_v53 = vadd.f32 %v1390_v38, %v626_v49  ;;  %v681_v54 = vadd.f32 %v1390_v38, %v642_v50  ;;  %v625_v55 = vmul.f32 0.16666667, %v514_v51  ;;  %v641_v56 = vmul.f32 0.16666667, %v594_v52 }
 0x114   : > { %v975_v57 = vpop.f32.mrf.mxu0  ;;  %v999_v58 = vpop.f32.mrf.mxu1 }
 0x115   : > { %697 = vst [vmem:[%s1396_s23 + $0x68] sm:$0xff] %v665_v53  ;;  %713 = vst [vmem:[%s1396_s23 + $0xe8] sm:$0xff] %v681_v54  ;;  %v664_v59 = vadd.f32 %v1390_v38, %v625_v55  ;;  %v680_v60 = vadd.f32 %v1390_v38, %v641_v56  ;;  %v628_v61 = vmul.f32 0.16666667, %v975_v57  ;;  %v644_v62 = vmul.f32 0.16666667, %v999_v58 }
 0x116   : > { %v524_v63 = vpop.f32.mrf.mxu0  ;;  %v604_v0 = vpop.f32.mrf.mxu1 }
 0x117   : > { %696 = vst [vmem:[%s1396_s23 + $0x60] sm:$0xff] %v664_v59  ;;  %712 = vst [vmem:[%s1396_s23 + $0xe0] sm:$0xff] %v680_v60  ;;  %v667_v1 = vadd.f32 %v1390_v38, %v628_v61  ;;  %v683_v2 = vadd.f32 %v1390_v38, %v644_v62  ;;  %v627_v3 = vmul.f32 0.16666667, %v524_v63  ;;  %v643_v4 = vmul.f32 0.16666667, %v604_v0 }
 0x119   : > { %699 = vst [vmem:[%s1396_s23 + $0x78] sm:$0xff] %v667_v1  ;;  %715 = vst [vmem:[%s1396_s23 + $0xf8] sm:$0xff] %v683_v2  ;;  %v666_v5 = vadd.f32 %v1390_v38, %v627_v3  ;;  %v682_v6 = vadd.f32 %v1390_v38, %v643_v4 }
 0x11b   : > { %698 = vst [vmem:[%s1396_s23 + $0x70] sm:$0xff] %v666_v5  ;;  %714 = vst [vmem:[%s1396_s23 + $0xf0] sm:$0xff] %v682_v6 }
 0x11c   : > { %1117 = shalt.err (!%p1114_p6)
}
 0x11d   : > { %s1118_s24 = scalar_lea.hbm %s1459_s6, 4096  ;;  %s1122_s19 = scalar_lea.hbm %s1518_s3, 8192 }
 0x11e   : > { %p1119_p7 = scmp.ne.s32.totalorder %s1459_s6, %s1118_s24  ;;  %p1123_p13 = scmp.lt.s32.totalorder %s1459_s6, %s1518_s3 }
 0x11f   : > { %p1124_p2 = scmp.lt.s32.totalorder %s1122_s19, %s1118_s24 }
 0x120   : > { %p1120_p10 = pnand %p1119_p7, %p1263_p9 }
 0x121   : > { %p1125_p8 = por %p1124_p2, %p1123_p13 }
 0x122   : > { %p1121_p4 = pneg %p1120_p10 }
 0x124   : > { %p1126_p12 = pnand %p1125_p8, %p1121_p4 }
 0x126   : > { %1129 = shalt.err (!%p1126_p12)
}
 0x127   : > { %s1190_s23 = smov 128   ;;  %s1191_s29 = smov 8  }
 0x128   : > { %1012 = dma.vmem_to_hbm [thread:$0]  (%p1263_p9), %s1461_s30, 4096, %s1459_s6, %s717_s15, %s1190_s23, %s1190_s23, %s1191_s29  }
 0x129 PF: > { %s749_s4 = sand.u32 1, %s1164_s12   ;;  %p1524_p0 = scmp.ge.s32.totalorder %s1184_s17, 2 }
 0x12a   : > { %s750_s5 = scalar_lea.sflag [#allocation4], %s749_s4 }
 0x12b   : > { %p1019_p1 = pnand %p1524_p0, %p1270_p11 }
 0x12d   : > { %p1020_p3 = pneg %p1019_p1 }
 0x12f   : > { %1159 = dma.done.wait (%p1020_p3), %s750_s5, 4096  }
 0x130   : > { %1161 = vsyncadd (%p1020_p3), %s750_s5, 4294963200  ;;  %s19_s17 = sadd.s32 1, %s1184_s17   ;;  %s1525_s12 = smov %s1168_s13 }
 0x131   : > { %p16_p5 = scmp.ge.s32.totalorder %s19_s17, 4   ;;  %s1526_s13 = smov %s1172_s14 }
 0x132   : > { %s1527_s14 = smov %s1268_s26  ;;  %s1528_s15 = smov %s1180_s16 }
 0x133   : > { %s1529_s16 = smov %s1531_s20  ;;  %18 = sbr.rel (!%p16_p5) target bundleno = 6 (0x6), region = 83 }
 0x138   :  { %755 = vsyncpa [#allocation3], 1 }
 0x139   :  { %757 = vsyncpa [#allocation3 + $0x1], 1 }
 0x13a   :  { %758 = vsyncpa [#allocation4], 1 }
 0x13b   :  { %760 = vsyncpa [#allocation4 + $0x1], 1 }

</bundles_post_ra>
